<compile_context>
chip_gen: v5e
topology: v5e:2x2
jax: 0.10.0
libtpu: 0.0.40
codegen_flags: <defaults>
</compile_context>

<pallas_src>
import jax
import jax.numpy as jnp
from jax.experimental import pallas as pl
from jax.experimental.pallas import tpu as pltpu


def _agg_kernel(w_ref, x_ref, y_ref, o_ref):
    # w_ref: SMEM (2,) float32 softmax weights.
    # x_ref / y_ref / o_ref: VMEM tiles of shape (TR, LANES).
    w0 = w_ref[0]
    w1 = w_ref[1]
    xf = x_ref[...].astype(jnp.float32)
    yf = y_ref[...].astype(jnp.float32)
    o_ref[...] = (w0 * xf + w1 * yf).astype(o_ref.dtype)


def _round_up(v: int, m: int) -> int:
    return -(-v // m) * m


def _sublane_min(dtype) -> int:
    # Minimum sublane tiling by element size: f32 -> 8, bf16 -> 16, i8/fp8 -> 32.
    return {4: 8, 2: 16, 1: 32}.get(jnp.dtype(dtype).itemsize, 8)


def aggregation_net(x: jax.Array, y: jax.Array, theta: jax.Array) -> jax.Array:
    """out = softmax(theta)[0]*x + softmax(theta)[1]*y, elementwise."""
    assert x.shape == y.shape and x.dtype == y.dtype
    orig_shape = x.shape
    n = x.size

    # Tiny parameter glue: numerically-stable softmax over the 2-element theta.
    w = jax.nn.softmax(theta.astype(jnp.float32).reshape(-1))  # (2,) float32

    subl = _sublane_min(x.dtype)

    # Widest lane-dense slab width that divides n -> reshape is a free view.
    lanes = None
    for cand in (1024, 512, 256, 128):
        if n % cand == 0:
            lanes = cand
            break

    padded = lanes is None
    if padded:
        # Rare fallback (n not a multiple of 128): pad the flat arrays.
        lanes = 128
        rows = -(-n // lanes)
        total = rows * lanes
        x2 = jnp.pad(x.reshape(-1), (0, total - n)).reshape(rows, lanes)
        y2 = jnp.pad(y.reshape(-1), (0, total - n)).reshape(rows, lanes)
    else:
        rows = n // lanes
        x2 = x.reshape(rows, lanes)  # free reshape of contiguous data
        y2 = y.reshape(rows, lanes)

    # Row-tile: ~1 MiB (f32-equivalent) per input block, cdiv grid; aim for >= 2 grid
    # steps when possible so the parallel axis can use both v7x TensorCores.
    tr_cap = max(subl, (256 * 1024) // lanes)
    if rows <= subl:
        tr = rows  # block equals full sublane extent -> always a legal tile
    else:
        tr = min(tr_cap, _round_up(pl.cdiv(rows, 2), subl))
    grid = (pl.cdiv(rows, tr),)

    out_2d = pl.pallas_call(
        _agg_kernel,
        out_shape=jax.ShapeDtypeStruct((rows, lanes), x.dtype),
        grid_spec=pltpu.PrefetchScalarGridSpec(
            num_scalar_prefetch=0,
            grid=grid,
            in_specs=[
                pl.BlockSpec(memory_space=pltpu.MemorySpace.SMEM),  # (2,) f32 weights
                pl.BlockSpec((tr, lanes), lambda i: (i, 0)),        # x tile
                pl.BlockSpec((tr, lanes), lambda i: (i, 0)),        # y tile
            ],
            out_specs=pl.BlockSpec((tr, lanes), lambda i: (i, 0)),
        ),
        compiler_params=pltpu.CompilerParams(
            dimension_semantics=("parallel",)),
    )(w, x2, y2)

    if padded:
        return out_2d.reshape(-1)[:n].reshape(orig_shape)
    return out_2d.reshape(orig_shape)


def _init_theta(key) -> jax.Array:
    # kaiming_uniform_ on a (1, 2) tensor: fan_in = 2, gain = sqrt(2) (a=0)
    # bound = gain * sqrt(3 / fan_in) = sqrt(3)
    bound = jnp.sqrt(3.0)
    return jax.random.uniform(key, (1, 2), jnp.float32, -bound, bound)


if __name__ == "__main__":
    key = jax.random.PRNGKey(0)
    k_theta, k_x, k_y = jax.random.split(key, 3)

    theta = _init_theta(k_theta)
    x = jax.random.normal(k_x, (2, 4, 16, 16), jnp.float32)  # NCHW
    y = jax.random.normal(k_y, (2, 4, 16, 16), jnp.float32)  # NCHW

    agg = jax.jit(aggregation_net)
    out = jax.block_until_ready(agg(x, y, theta))

    # Reference check (pure JAX).
    w = jax.nn.softmax(theta.astype(jnp.float32).reshape(-1))
    ref = w[0] * x + w[1] * y
    assert out.shape == x.shape
    assert jnp.allclose(out, ref, atol=1e-5, rtol=1e-5)

    print("KERNEL_OK")
</pallas_src>

<mosaic_0001>
module attributes {stable_mosaic.version = 11 : i64} {
  func.func @_agg_kernel(%arg0: i32, %arg1: memref<2xf32, #tpu.memory_space<smem>>, %arg2: memref<2x1024xf32, #tpu.memory_space<vmem>>, %arg3: memref<2x1024xf32, #tpu.memory_space<vmem>>, %arg4: memref<2x1024xf32, #tpu.memory_space<vmem>>) attributes {dimension_semantics = [#tpu.dimension_semantics<parallel>], iteration_bounds = array<i64: 1>, scalar_prefetch = 0 : i64, scratch_operands = 0 : i64, tpu.core_type = #tpu.core_type<tc>, window_params = [{transform_indices = @transform_0, window_bounds = array<i64: 2>}, {transform_indices = @transform_1, window_bounds = array<i64: 2, 1024>}, {transform_indices = @transform_2, window_bounds = array<i64: 2, 1024>}, {transform_indices = @transform_3, window_bounds = array<i64: 2, 1024>}]} {
    %c0 = arith.constant 0 : index
    %0 = memref.load %arg1[%c0] : memref<2xf32, #tpu.memory_space<smem>>
    %c1 = arith.constant 1 : index
    %1 = memref.load %arg1[%c1] : memref<2xf32, #tpu.memory_space<smem>>
    %c0_0 = arith.constant 0 : index
    %c0_1 = arith.constant 0 : index
    %2 = vector.load %arg2[%c0_0, %c0_1] : memref<2x1024xf32, #tpu.memory_space<vmem>>, vector<2x1024xf32>
    %c0_2 = arith.constant 0 : index
    %c0_3 = arith.constant 0 : index
    %3 = vector.load %arg3[%c0_2, %c0_3] : memref<2x1024xf32, #tpu.memory_space<vmem>>, vector<2x1024xf32>
    %4 = vector.broadcast %0 : f32 to vector<2x1024xf32>
    %5 = arith.mulf %4, %2 : vector<2x1024xf32>
    %6 = vector.broadcast %1 : f32 to vector<2x1024xf32>
    %7 = arith.mulf %6, %3 : vector<2x1024xf32>
    %8 = arith.addf %5, %7 : vector<2x1024xf32>
    %c0_4 = arith.constant 0 : index
    %c0_5 = arith.constant 0 : index
    %9 = vector.load %arg4[%c0_4, %c0_5] : memref<2x1024xf32, #tpu.memory_space<vmem>>, vector<2x1024xf32>
    tpu.vector_store %arg4[%c0_4, %c0_5], %8 {strides = array<i32>} : memref<2x1024xf32, #tpu.memory_space<vmem>>, vector<2x1024xf32>,
    return
  }
  func.func @transform_0(%arg0: i32) -> i32 {
    %c0_i32 = arith.constant 0 : i32
    %c0_i32_0 = arith.constant 0 : i32
    return %c0_i32 : i32
  }
  func.func @transform_1(%arg0: i32) -> (i32, i32) {
    %c0_i32 = arith.constant 0 : i32
    %c0_i32_0 = arith.constant 0 : i32
    return %arg0, %c0_i32 : i32, i32
  }
  func.func @transform_2(%arg0: i32) -> (i32, i32) {
    %c0_i32 = arith.constant 0 : i32
    %c0_i32_0 = arith.constant 0 : i32
    return %arg0, %c0_i32 : i32, i32
  }
  func.func @transform_3(%arg0: i32) -> (i32, i32) {
    %c0_i32 = arith.constant 0 : i32
    %c0_i32_0 = arith.constant 0 : i32
    return %arg0, %c0_i32 : i32, i32
  }
}

</mosaic_0001>

<bundles_post_ra>
// kernel: aggregation_net.1
= control target key start
LH: loop header
LB: loop body
LE: loop exit
PB: predicated region body
PF: predicated region fallthrough
CT: control target
= control target key end

     0   :  { %8 = vsyncpa [#allocation3], 0  ;;  %s64_s15 = smov [#allocation2]   ;;  %s106_s0 = inlined_call_operand.vmem [shape: f32[2], index: 0, kind: input, shape index: {}]   ;;  %s107_s1 = inlined_call_operand.vmem [shape: f32[2,1024], index: 1, kind: input, shape index: {}]   ;;  %s108_s2 = inlined_call_operand.vmem [shape: f32[2,1024], index: 2, kind: input, shape index: {}]   ;;  %s109_s3 = inlined_call_operand.vmem [shape: f32[2,1024], index: 3, kind: output, shape index: {}]  }
   0x1   :  { %s14_s14 = sshll.u32 %s106_s0, 4  ;;  %s15_s14 = int_to_ptr.vmem [resolvable:$true] %s14_s14 }
   0x2   :  { %17 = dma.vmem_to_smem %s15_s14, 16, %s64_s15, [#allocation3]  }
   0x3   :  { %62 = dma.done.wait [#allocation3], 16  }
   0x4   :  { %63 = vsyncadd [#allocation3], 4294967280 }
   0x5   :  { %26 = sfence }
   0x6   :  { %s27_s16 = sld [smem:[#allocation2]]  ;;  %v29_v0 = vld [vmem:[%s107_s1] sm:$0xff]  ;;  %v30_v1 = vld [vmem:[%s107_s1 + $0x8] sm:$0xff] }
   0x7   :  { %s48_s17 = sld [smem:[#allocation2 + $0x1]]  ;;  %v31_v2 = vld [vmem:[%s108_s2] sm:$0xff]  ;;  %v32_v3 = vld [vmem:[%s108_s2 + $0x8] sm:$0xff] }
   0xc   :  { %v33_v4 = vstv %s27_s16 }
   0xd   :  { %v34_v5 = vmul.f32 %v33_v4, %v29_v0  ;;  %v36_v6 = vstv %s48_s17  ;;  %v35_v7 = vmul.f32 %v33_v4, %v30_v1 }
   0xe   :  { %v37_v8 = vmul.f32 %v36_v6, %v31_v2  ;;  %v38_v9 = vmul.f32 %v36_v6, %v32_v3 }
  0x10   :  { %v39_v10 = vadd.f32 %v37_v8, %v34_v5  ;;  %v40_v11 = vadd.f32 %v38_v9, %v35_v7 }
  0x12   :  { %41 = vst [vmem:[%s109_s3] sm:$0xff] %v39_v10 }
  0x13   :  { %42 = vst [vmem:[%s109_s3 + $0x8] sm:$0xff] %v40_v11 }
  0x14   :  { %47 = vsyncpa [#allocation3], 1 }

</bundles_post_ra>
